<compile_context>
chip_gen: v7x
topology: tpu7x:2x2x1
jax: 0.10.0
libtpu: 0.0.40
codegen_flags: <defaults>
</compile_context>

<pallas_src>
import functools

import jax
import jax.numpy as jnp
from jax.experimental import pallas as pl
from jax.experimental.pallas import tpu as pltpu

_EPS = 1e-12          # matches ATen cosine_embedding_loss EPSILON
_LANES = 128
_MAX_BLOCK_ROWS = 1024  # 1024*128 = 128K (sample,dir) rows per grid step


def _round_up(x, m):
    return ((x + m - 1) // m) * m


# ---------------------------------------------------------------------------
# Kernel bodies
# ---------------------------------------------------------------------------
def _block_loss(pred_ref, target_ref):
    """Per-row cosine loss for one block.

    pred_ref/target_ref: (C, R, 128) refs. Returns (R, 128) f32 = 1 - cos.
    The reduction over C is an unrolled sum over the leading (major) axis,
    i.e. C-1 full-vreg VALU adds.
    """
    p = pred_ref[...].astype(jnp.float32)
    t = target_ref[...].astype(jnp.float32)
    dot = jnp.sum(p * t, axis=0)                    # (R, 128)
    m1 = jnp.sum(p * p, axis=0) + _EPS
    m2 = jnp.sum(t * t, axis=0) + _EPS
    cos = dot * jax.lax.rsqrt(m1 * m2)              # rsqrt -> EUP slot (free)
    return 1.0 - cos


def _mean_kernel_w(pred_ref, target_ref, w_ref, psum_ref):
    # weight is zero-padded, so padded rows contribute 0 to the sum.
    loss = _block_loss(pred_ref, target_ref) * w_ref[...].astype(jnp.float32)
    psum_ref[...] = jnp.sum(loss, axis=0, keepdims=True)       # (1, 128) lane partials


def _mean_kernel_nw(pred_ref, target_ref, psum_ref, *, n_valid, block_rows):
    loss = _block_loss(pred_ref, target_ref)                    # (R, 128)
    base = pl.program_id(0) * (block_rows * _LANES)
    idx = (jax.lax.broadcasted_iota(jnp.int32, loss.shape, 0) * _LANES
           + jax.lax.broadcasted_iota(jnp.int32, loss.shape, 1))
    loss = jnp.where(base + idx < n_valid, loss, 0.0)           # mask padded rows
    psum_ref[...] = jnp.sum(loss, axis=0, keepdims=True)        # (1, 128) lane partials


def _none_kernel_w(pred_ref, target_ref, w_ref, out_ref):
    out_ref[...] = (_block_loss(pred_ref, target_ref)
                    * w_ref[...].astype(jnp.float32))


def _none_kernel_nw(pred_ref, target_ref, out_ref):
    out_ref[...] = _block_loss(pred_ref, target_ref)


# ---------------------------------------------------------------------------
# pallas_call wrapper
# ---------------------------------------------------------------------------
def _pts_dir_cos_pallas(pred, target, weight, reduction):
    """pred/target: (S, D, C); weight: (S, D) or None.

    reduction == 'mean' -> scalar sum of weighted per-(sample,dir) losses.
    reduction == 'none' -> (S, D) weighted per-(sample,dir) losses (f32).
    """
    s, d, c = pred.shape
    n = s * d

    rows = max(1, -(-n // _LANES))
    block_rows = min(_MAX_BLOCK_ROWS, _round_up(rows, 8))
    rows_pad = _round_up(rows, block_rows)
    num_blocks = rows_pad // block_rows
    n_pad = rows_pad * _LANES

    # (S, D, C) -> (C, N): coords off the lane axis; keep native dtype (cast in-kernel).
    pred_t = jnp.moveaxis(pred, -1, 0).reshape(c, n)
    target_t = jnp.moveaxis(target, -1, 0).reshape(c, n)
    if n_pad != n:
        pad = ((0, 0), (0, n_pad - n))
        pred_t = jnp.pad(pred_t, pad)
        target_t = jnp.pad(target_t, pad)
    pred_t = pred_t.reshape(c, rows_pad, _LANES)
    target_t = target_t.reshape(c, rows_pad, _LANES)

    has_weight = weight is not None
    inputs = [pred_t, target_t]
    in_specs = [
        pl.BlockSpec((c, block_rows, _LANES), lambda i: (0, i, 0)),
        pl.BlockSpec((c, block_rows, _LANES), lambda i: (0, i, 0)),
    ]
    if has_weight:
        w = weight.reshape(n)
        if n_pad != n:
            w = jnp.pad(w, (0, n_pad - n))      # zero-padding also masks padded rows
        w = w.reshape(rows_pad, _LANES)
        inputs.append(w)
        in_specs.append(pl.BlockSpec((block_rows, _LANES), lambda i: (i, 0)))

    cparams = pltpu.CompilerParams(
        dimension_semantics=("parallel",),
        vmem_limit_bytes=32 * 1024 * 1024,
    )

    if reduction == 'mean':
        if has_weight:
            kernel = _mean_kernel_w
        else:
            kernel = functools.partial(
                _mean_kernel_nw, n_valid=n, block_rows=block_rows)
        partials = pl.pallas_call(
            kernel,
            grid=(num_blocks,),
            in_specs=in_specs,
            out_specs=pl.BlockSpec((1, _LANES), lambda i: (0, i)),
            out_shape=jax.ShapeDtypeStruct((1, num_blocks * _LANES), jnp.float32),
            compiler_params=cparams,
        )(*inputs)
        # Tiny final reduction over num_blocks*128 lane-partials in XLA.
        return jnp.sum(partials)

    # reduction == 'none': lane-dense per-row output, sliced/reshaped back.
    kernel = _none_kernel_w if has_weight else _none_kernel_nw
    per = pl.pallas_call(
        kernel,
        grid=(num_blocks,),
        in_specs=in_specs,
        out_specs=pl.BlockSpec((block_rows, _LANES), lambda i: (i, 0)),
        out_shape=jax.ShapeDtypeStruct((rows_pad, _LANES), jnp.float32),
        compiler_params=cparams,
    )(*inputs)
    return per.reshape(n_pad)[:n].reshape(s, d)


# ---------------------------------------------------------------------------
# Module wrapper (mirrors the PyTorch forward semantics)
# ---------------------------------------------------------------------------
class PtsDirCosLoss:
    """JAX/Pallas port of the PyTorch PtsDirCosLoss module."""

    def __init__(self, reduction='mean', loss_weight=1.0):
        self.reduction = reduction
        self.loss_weight = float(loss_weight)

    def __call__(self, pred, target, weight=None, avg_factor=None,
                 reduction_override=None):
        assert reduction_override in (None, 'none', 'mean', 'sum')
        reduction = reduction_override if reduction_override else self.reduction

        if target.size == 0:
            # matches `return pred.sum() * 0`
            return jnp.sum(pred) * 0.0

        if avg_factor is None:
            raise ValueError('avg_factor should not be none for OrderedPtsL1Loss')

        if reduction == 'mean':
            total = _pts_dir_cos_pallas(pred, target, weight, 'mean')
            loss = total / avg_factor
        elif reduction == 'none':
            loss = _pts_dir_cos_pallas(pred, target, weight, 'none')
        else:
            raise ValueError('avg_factor can not be used with reduction="sum"')
        return self.loss_weight * loss


# ---------------------------------------------------------------------------
# Pure-JAX references + self-test
# ---------------------------------------------------------------------------
def _reference_per(pred, target, weight):
    p = pred.astype(jnp.float32)
    t = target.astype(jnp.float32)
    dot = jnp.sum(p * t, axis=-1)
    m1 = jnp.sum(p * p, axis=-1) + _EPS
    m2 = jnp.sum(t * t, axis=-1) + _EPS
    loss = 1.0 - dot / jnp.sqrt(m1 * m2)
    if weight is not None:
        loss = loss * weight
    return loss


def _reference_mean(pred, target, weight, avg_factor, loss_weight=1.0):
    return loss_weight * jnp.sum(_reference_per(pred, target, weight)) / avg_factor


if __name__ == "__main__":
    key = jax.random.PRNGKey(0)
    k1, k2, k3 = jax.random.split(key, 3)

    num_samples, num_dir, num_coords = 2, 20, 2   # small shapes
    pred = jax.random.normal(k1, (num_samples, num_dir, num_coords), jnp.float32)
    target = jax.random.normal(k2, (num_samples, num_dir, num_coords), jnp.float32)
    weight = jax.random.uniform(k3, (num_samples, num_dir), jnp.float32)
    avg_factor = float(num_samples * num_dir)

    loss_mod = PtsDirCosLoss(reduction='mean', loss_weight=1.0)

    # mean, with weight
    out = jax.block_until_ready(
        loss_mod(pred, target, weight=weight, avg_factor=avg_factor))
    ref = _reference_mean(pred, target, weight, avg_factor)
    assert jnp.allclose(out, ref, atol=1e-5, rtol=1e-5), (out, ref)

    # mean, without weight (exercises the in-kernel padding mask)
    out_nw = jax.block_until_ready(
        loss_mod(pred, target, weight=None, avg_factor=avg_factor))
    ref_nw = _reference_mean(pred, target, None, avg_factor)
    assert jnp.allclose(out_nw, ref_nw, atol=1e-5, rtol=1e-5), (out_nw, ref_nw)

    # reduction='none', with weight (lane-dense per-row output path)
    out_none = jax.block_until_ready(
        loss_mod(pred, target, weight=weight, avg_factor=avg_factor,
                 reduction_override='none'))
    ref_none = _reference_per(pred, target, weight)
    assert out_none.shape == (num_samples, num_dir)
    assert jnp.allclose(out_none, ref_none, atol=1e-5, rtol=1e-5)

    print("KERNEL_OK")
</pallas_src>

<mosaic_0001>
module attributes {stable_mosaic.version = 11 : i64} {
  func.func @_mean_kernel_w(%arg0: i32, %arg1: memref<2x8x128xf32, #tpu.memory_space<vmem>>, %arg2: memref<2x8x128xf32, #tpu.memory_space<vmem>>, %arg3: memref<8x128xf32, #tpu.memory_space<vmem>>, %arg4: memref<1x128xf32, #tpu.memory_space<vmem>>) attributes {dimension_semantics = [#tpu.dimension_semantics<parallel>], iteration_bounds = array<i64: 1>, scalar_prefetch = 0 : i64, scratch_operands = 0 : i64, tpu.core_type = #tpu.core_type<tc>, window_params = [{transform_indices = @transform_0, window_bounds = array<i64: 2, 8, 128>}, {transform_indices = @transform_1, window_bounds = array<i64: 2, 8, 128>}, {transform_indices = @transform_2, window_bounds = array<i64: 8, 128>}, {transform_indices = @transform_3, window_bounds = array<i64: 1, 128>}]} {
    %c0 = arith.constant 0 : index
    %c0_0 = arith.constant 0 : index
    %c0_1 = arith.constant 0 : index
    %0 = vector.load %arg1[%c0, %c0_0, %c0_1] : memref<2x8x128xf32, #tpu.memory_space<vmem>>, vector<2x8x128xf32>
    %c0_2 = arith.constant 0 : index
    %c0_3 = arith.constant 0 : index
    %c0_4 = arith.constant 0 : index
    %1 = vector.load %arg2[%c0_2, %c0_3, %c0_4] : memref<2x8x128xf32, #tpu.memory_space<vmem>>, vector<2x8x128xf32>
    %2 = arith.mulf %0, %1 : vector<2x8x128xf32>
    %cst = arith.constant dense<0.000000e+00> : vector<8x128xf32>
    %3 = vector.multi_reduction <add>, %2, %cst [0] : vector<2x8x128xf32> to vector<8x128xf32>
    %4 = arith.mulf %0, %0 : vector<2x8x128xf32>
    %cst_5 = arith.constant dense<0.000000e+00> : vector<8x128xf32>
    %5 = vector.multi_reduction <add>, %4, %cst_5 [0] : vector<2x8x128xf32> to vector<8x128xf32>
    %cst_6 = arith.constant 9.99999996E-13 : f32
    %6 = vector.broadcast %cst_6 : f32 to vector<8x128xf32>
    %7 = arith.addf %5, %6 : vector<8x128xf32>
    %8 = arith.mulf %1, %1 : vector<2x8x128xf32>
    %cst_7 = arith.constant dense<0.000000e+00> : vector<8x128xf32>
    %9 = vector.multi_reduction <add>, %8, %cst_7 [0] : vector<2x8x128xf32> to vector<8x128xf32>
    %cst_8 = arith.constant 9.99999996E-13 : f32
    %10 = vector.broadcast %cst_8 : f32 to vector<8x128xf32>
    %11 = arith.addf %9, %10 : vector<8x128xf32>
    %12 = arith.mulf %7, %11 : vector<8x128xf32>
    %13 = math.rsqrt %12 : vector<8x128xf32>
    %14 = arith.mulf %3, %13 : vector<8x128xf32>
    %cst_9 = arith.constant 1.000000e+00 : f32
    %15 = vector.broadcast %cst_9 : f32 to vector<8x128xf32>
    %16 = arith.subf %15, %14 : vector<8x128xf32>
    %c0_10 = arith.constant 0 : index
    %c0_11 = arith.constant 0 : index
    %17 = vector.load %arg3[%c0_10, %c0_11] : memref<8x128xf32, #tpu.memory_space<vmem>>, vector<8x128xf32>
    %18 = arith.mulf %16, %17 : vector<8x128xf32>
    %cst_12 = arith.constant dense<0.000000e+00> : vector<128xf32>
    %19 = vector.multi_reduction <add>, %18, %cst_12 [0] : vector<8x128xf32> to vector<128xf32>
    %20 = vector.shape_cast %19 : vector<128xf32> to vector<1x128xf32>
    %c0_13 = arith.constant 0 : index
    %c0_14 = arith.constant 0 : index
    %21 = vector.load %arg4[%c0_13, %c0_14] : memref<1x128xf32, #tpu.memory_space<vmem>>, vector<1x128xf32>
    tpu.vector_store %arg4[%c0_13, %c0_14], %20 {strides = array<i32>} : memref<1x128xf32, #tpu.memory_space<vmem>>, vector<1x128xf32>,
    return
  }
  func.func @transform_0(%arg0: i32) -> (i32, i32, i32) {
    %c0_i32 = arith.constant 0 : i32
    %c0_i32_0 = arith.constant 0 : i32
    %c0_i32_1 = arith.constant 0 : i32
    return %c0_i32, %arg0, %c0_i32_0 : i32, i32, i32
  }
  func.func @transform_1(%arg0: i32) -> (i32, i32, i32) {
    %c0_i32 = arith.constant 0 : i32
    %c0_i32_0 = arith.constant 0 : i32
    %c0_i32_1 = arith.constant 0 : i32
    return %c0_i32, %arg0, %c0_i32_0 : i32, i32, i32
  }
  func.func @transform_2(%arg0: i32) -> (i32, i32) {
    %c0_i32 = arith.constant 0 : i32
    %c0_i32_0 = arith.constant 0 : i32
    return %arg0, %c0_i32 : i32, i32
  }
  func.func @transform_3(%arg0: i32) -> (i32, i32) {
    %c0_i32 = arith.constant 0 : i32
    %c0_i32_0 = arith.constant 0 : i32
    return %c0_i32, %arg0 : i32, i32
  }
}

</mosaic_0001>

<bundles_post_ra>
// kernel: tpu_custom_call.1
= control target key start
LH: loop header
LB: loop body
LE: loop exit
PB: predicated region body
PF: predicated region fallthrough
CT: control target
= control target key end

     0   :  { %8 = vsyncpa [#allocation3], 0  ;;  %s281_s0 = inlined_call_operand.hbm [shape: f32[2,8,128], index: 0, kind: input, shape index: {}]   ;;  %s282_s1 = inlined_call_operand.hbm [shape: f32[2,8,128], index: 1, kind: input, shape index: {}]   ;;  %s283_s2 = inlined_call_operand.hbm [shape: f32[8,128], index: 2, kind: input, shape index: {}]   ;;  %s284_s3 = inlined_call_operand.hbm [shape: f32[1,128], index: 3, kind: output, shape index: {}]  }
   0x1   :  { %9 = vsyncpa [#allocation6], 0 }
   0x2   :  { %10 = vsyncpa [#allocation4], 0  ;;  %s200_s12 = smov [#allocation5]   ;;  %s201_s14 = smov [#allocation2]  }
   0x3   :  { %s28_s13 = sshll.u32 %s200_s12, 4  ;;  %s16_s15 = sshll.u32 %s201_s14, 4  ;;  %s29_s13 = int_to_ptr.vmem [resolvable:$true] %s28_s13  ;;  %s226_s15 = int_to_ptr.vmem [resolvable:$true] %s16_s15 }
   0x4   :  { %s106_s18 = scalar_lea.hbm %s282_s1, 256 }
   0x5   :  { %p107_p0 = scmp.ne.s32.totalorder %s282_s1, %s106_s18  ;;  %p110_p1 = scmp.lt.u32.totalorder %s106_s18, %s282_s1 }
   0x7   :  { %p112_p2 = pnand %p110_p1, %p107_p0 }
   0x9   :  { %115 = shalt.err (!%p112_p2)
}
   0xa   :  { %s116_s23 = scalar_lea.vmem %s29_s13, 256  ;;  %p121_p4 = scmp.lt.s32.totalorder %s29_s13, %s29_s13 }
   0xb   :  { %p117_p3 = scmp.ne.s32.totalorder %s29_s13, %s116_s23  ;;  %p122_p5 = scmp.lt.s32.totalorder %s116_s23, %s116_s23 }
   0xd   :  { %p123_p6 = por %p122_p5, %p121_p4 }
   0xf   :  { %p124_p7 = pnand %p123_p6, %p117_p3 }
  0x11   :  { %127 = shalt.err (!%p124_p7)
}
  0x12   :  { %s202_s24 = smov 128   ;;  %s203_s25 = smov 8  }
  0x13   :  { %34 = dma.hbm_to_vmem [thread:$0]  %s282_s1, 256, %s29_s13, [#allocation6], %s202_s24, %s202_s24, %s203_s25  }
  0x14   :  { %s128_s30 = scalar_lea.hbm %s281_s0, 256 }
  0x15   :  { %p129_p8 = scmp.ne.s32.totalorder %s281_s0, %s128_s30  ;;  %p132_p9 = scmp.lt.u32.totalorder %s128_s30, %s281_s0 }
  0x17   :  { %p134_p10 = pnand %p132_p9, %p129_p8 }
  0x19   :  { %137 = shalt.err (!%p134_p10)
}
  0x1a   :  { %s138_s8 = scalar_lea.vmem %s226_s15, 256  ;;  %p143_p12 = scmp.lt.s32.totalorder %s226_s15, %s226_s15 }
  0x1b   :  { %p139_p11 = scmp.ne.s32.totalorder %s226_s15, %s138_s8  ;;  %p144_p13 = scmp.lt.s32.totalorder %s138_s8, %s138_s8 }
  0x1d   :  { %p145_p0 = por %p144_p13, %p143_p12 }
  0x1f   :  { %p146_p1 = pnand %p145_p0, %p139_p11 }
  0x21   :  { %149 = shalt.err (!%p146_p1)
}
  0x22   :  { %22 = dma.hbm_to_vmem [thread:$0]  %s281_s0, 256, %s226_s15, [#allocation3], %s202_s24, %s202_s24, %s203_s25  }
  0x23   :  { %s204_s10 = smov [#allocation7]   ;;  %s150_s14 = scalar_lea.hbm %s283_s2, 128 }
  0x24   :  { %s41_s11 = sshll.u32 %s204_s10, 4  ;;  %p151_p2 = scmp.ne.s32.totalorder %s283_s2, %s150_s14  ;;  %s42_s11 = int_to_ptr.vmem [resolvable:$true] %s41_s11 }
  0x25   :  { %p154_p3 = scmp.lt.u32.totalorder %s150_s14, %s283_s2 }
  0x27   :  { %p156_p4 = pnand %p154_p3, %p151_p2 }
  0x29   :  { %159 = shalt.err (!%p156_p4)
}
  0x2a   :  { %s160_s20 = scalar_lea.vmem %s42_s11, 128  ;;  %p165_p6 = scmp.lt.s32.totalorder %s42_s11, %s42_s11 }
  0x2b   :  { %p161_p5 = scmp.ne.s32.totalorder %s42_s11, %s160_s20  ;;  %p166_p7 = scmp.lt.s32.totalorder %s160_s20, %s160_s20 }
  0x2d   :  { %p167_p8 = por %p166_p7, %p165_p6 }
  0x2f   :  { %p168_p9 = pnand %p167_p8, %p161_p5 }
  0x31   :  { %171 = shalt.err (!%p168_p9)
}
  0x32   :  { %44 = dma.hbm_to_vmem [thread:$0]  %s283_s2, 128, %s42_s11, [#allocation6]  }
  0x33   :  { %194 = dma.done.wait [#allocation3], 256  }
  0x34   :  { %195 = vsyncadd [#allocation3], 4294967040 }
  0x35   :  { %196 = dma.done.wait [#allocation6], 384  }
  0x36   :  { %197 = vsyncadd [#allocation6], 4294966912  ;;  %v54_v0 = vld [vmem:[#allocation2] sm:$0xff]  ;;  %v55_v1 = vld [vmem:[#allocation2 + $0x8] sm:$0xff]  ;;  %s205_s2 = smov [#allocation8]  }
  0x37   :  { %v56_v2 = vld [vmem:[#allocation5] sm:$0xff]  ;;  %v57_v3 = vld [vmem:[#allocation5 + $0x8] sm:$0xff]  ;;  %v61_v4 = vmul.f32 %v54_v0, %v54_v0  ;;  %v62_v5 = vmul.f32 %v55_v1, %v55_v1  ;;  %v73_v18 = vld [vmem:[#allocation7] sm:$0xff]  ;;  %s88_s21 = sshll.u32 %s205_s2, 4  ;;  %s89_s21 = int_to_ptr.vmem [resolvable:$true] %s88_s21 }
  0x38   :  { %v65_v6 = vmul.f32 %v56_v2, %v56_v2  ;;  %v66_v7 = vmul.f32 %v57_v3, %v57_v3  ;;  %v58_v13 = vmul.f32 %v56_v2, %v54_v0  ;;  %v59_v14 = vmul.f32 %v57_v3, %v55_v1  ;;  %s172_s22 = scalar_lea.vmem %s89_s21, 16  ;;  %s176_s23 = scalar_lea.vmem %s89_s21, 32 }
  0x39   :  { %v63_v8 = vadd.f32 %v62_v5, %v61_v4  ;;  %p173_p10 = scmp.ne.s32.totalorder %s89_s21, %s172_s22  ;;  %p177_p11 = scmp.lt.s32.totalorder %s89_s21, %s89_s21 }
  0x3a   :  { %v67_v9 = vadd.f32 %v66_v7, %v65_v6  ;;  %v60_v15 = vadd.f32 %v59_v14, %v58_v13  ;;  %p178_p12 = scmp.lt.s32.totalorder %s176_s23, %s172_s22 }
  0x3b   :  { %v64_v10 = vadd.f32 1e-12, %v63_v8 }
  0x3c   :  { %v68_v11 = vadd.f32 1e-12, %v67_v9  ;;  %p179_p13 = por %p178_p12, %p177_p11 }
  0x3e   :  { %v69_v12 = vmul.f32 %v68_v11, %v64_v10  ;;  %p180_p0 = pnand %p179_p13, %p173_p10 }
  0x40   :  { %104 = vrsqrt.f32 %v69_v12 }
  0x4a   :  { %v105_v16 = vpop.eup %104 }
  0x4b   :  { %v71_v17 = vmul.f32 %v105_v16, %v60_v15 }
  0x4d   :  { %v72_v19 = vsub.f32 1.0, %v71_v17 }
  0x4f   :  { %v74_v20 = vmul.f32 %v73_v18, %v72_v19 }
  0x51   :  { %v75_v21 = vrot.slane %v74_v20, 4 }
  0x53   :  { %v76_v22 = vadd.f32 %v75_v21, %v74_v20 }
  0x55   :  { %v77_v23 = vrot.slane %v76_v22, 2 }
  0x57   :  { %v78_v24 = vadd.f32 %v77_v23, %v76_v22 }
  0x59   :  { %v79_v25 = vrot.slane %v78_v24, 1 }
  0x5b   :  { %v80_v26 = vadd.f32 %v79_v25, %v78_v24 }
  0x5d   :  { %81 = vst [vmem:[#allocation8] sm:$0x1] %v80_v26 }
  0x5e   :  { %183 = shalt.err (!%p180_p0)
}
  0x5f   :  { %s184_s26 = scalar_lea.hbm %s284_s3, 16 }
  0x60   :  { %p185_p1 = scmp.ne.s32.totalorder %s284_s3, %s184_s26  ;;  %p188_p2 = scmp.lt.u32.totalorder %s184_s26, %s284_s3 }
  0x62   :  { %p190_p3 = pnand %p188_p2, %p185_p1 }
  0x64   :  { %193 = shalt.err (!%p190_p3)
}
  0x65   :  { %91 = dma.vmem_to_hbm [thread:$0]  %s89_s21, 16, %s284_s3, [#allocation4]  }
  0x66   :  { %198 = dma.done.wait [#allocation4], 16  }
  0x67   :  { %199 = vsyncadd [#allocation4], 4294967280 }
  0x68   :  { %95 = vsyncpa [#allocation3], 1 }
  0x69   :  { %96 = vsyncpa [#allocation6], 1 }
  0x6a   :  { %97 = vsyncpa [#allocation4], 1 }

</bundles_post_ra>
